<compile_context>
chip_gen: v6e
topology: v6e:2x2x1
jax: 0.10.0
libtpu: 0.0.40
codegen_flags: <defaults>
</compile_context>

<pallas_src>
import jax
import jax.numpy as jnp
from jax import lax
from jax.experimental import pallas as pl
from jax.experimental.pallas import tpu as pltpu

_LANES = 128
_SUBLANES = 8
_VMEM_BUDGET_BYTES = 40 * 1024 * 1024   # target working set (inputs x2 bufs + temps)
_VMEM_LIMIT_BYTES = 48 * 1024 * 1024    # scoped VMEM; leaves headroom on v7x (64 MiB)


def _make_dice_kernel(C, mC, s_t, s_valid, use_mask):
    """Kernel closure.

    C: channels, mC: mask channels (1 or C), s_t: sublane rows per tile,
    s_valid: total valid sublane rows (ragged last tile masked in-kernel).
    """
    needs_row_mask = (s_valid % s_t) != 0

    def kernel(*refs):
        if use_mask:
            x_ref, y_ref, m_ref, out_ref = refs
        else:
            x_ref, y_ref, out_ref = refs
            m_ref = None

        # ---- pass 1: per-position channel max (stable softmax) ----------------
        x_max = x_ref[0, 0].astype(jnp.float32)
        for c in range(1, C):
            x_max = jnp.maximum(x_max, x_ref[0, c].astype(jnp.float32))

        # ---- pass 2: exp(x - max) per channel (live set ~1 f32 tile) + sum ----
        ex = [None] * C
        s_sum = None
        for c in range(C):
            ex[c] = jnp.exp(x_ref[0, c].astype(jnp.float32) - x_max)
            s_sum = ex[c] if s_sum is None else s_sum + ex[c]

        # Ragged last spatial tile: rows >= valid_rows hold unspecified data.
        if needs_row_mask:
            s = pl.program_id(1)
            valid_rows = jnp.minimum(jnp.int32(s_valid) - s * jnp.int32(s_t),
                                     jnp.int32(s_t))
            row_ids = lax.broadcasted_iota(jnp.int32, (s_t, _LANES), 0)
            valid = row_ids < valid_rows
            n_rows = valid_rows.astype(jnp.float32)
        else:
            valid = None
            n_rows = jnp.float32(s_t)

        # ---- pass 3: accumulate dice term per channel --------------------------
        #   sm = ex/s_sum  =>  (2*sm*y + 1)/(sm + y + 1) = (2*ex*y + S)/(ex + S*(y+1))
        acc = jnp.zeros((s_t, _LANES), jnp.float32)
        for c in range(C):
            yc = y_ref[0, c].astype(jnp.float32)
            num = 2.0 * ex[c] * yc + s_sum
            den = ex[c] + s_sum * (yc + 1.0)
            term = num / den
            if use_mask:
                mc = m_ref[0, c if mC == C else 0].astype(jnp.float32)
                term = term * mc
            if valid is not None:
                term = jnp.where(valid, term, 0.0)
            acc = acc + term

        # loss = 1 - term; fold the "1" into the reduction:
        #   sum(loss over valid positions) = C * n_valid_rows (per lane) - sum(term)
        lane_sum = jnp.sum(acc, axis=0)                    # (128,)
        const = jnp.float32(C) * n_rows
        out_ref[...] = (const - lane_sum).reshape(1, 1, 1, _LANES)

    return kernel


def _pick_spatial_tile(s_needed, row_bytes, want_multi_tile):
    """Pick sublane rows per grid step so the pipelined working set fits VMEM."""
    cap = max(_SUBLANES, (_VMEM_BUDGET_BYTES // row_bytes) // _SUBLANES * _SUBLANES)
    s_t = s_needed
    if want_multi_tile and s_needed >= 2 * _SUBLANES:
        # N == 1: make sure there are >= 2 grid steps so both v7x TCs get work.
        s_t = (s_needed // 2) // _SUBLANES * _SUBLANES
    s_t = min(s_t, cap)
    if s_t >= s_needed:
        return s_needed, 1                                  # single full-extent block
    s_t = max(_SUBLANES, s_t // _SUBLANES * _SUBLANES)      # (8,128) rule for partials
    return s_t, -(-s_needed // s_t)


def dice_loss(x, y, mask=None):
    """Pallas implementation of DiceLoss.forward (inputs in NCHW)."""
    N, C, H, W = x.shape
    HW = H * W
    use_mask = mask is not None

    s_valid = -(-HW // _LANES)              # cdiv(HW, 128): valid sublane rows
    pad = s_valid * _LANES - HW             # lane padding of the final row only

    def to_rows(a, c_dim):
        a3 = a.reshape(N, c_dim, HW)
        if pad:
            # TODO(synk): padding HW to a lane multiple still copies the whole array;
            # a dedicated ragged-tail path would avoid this extra HBM pass.
            a3 = jnp.pad(a3, ((0, 0), (0, 0), (0, pad)))
        return a3.reshape(N, c_dim, s_valid, _LANES)        # zero-copy when pad == 0

    inputs = [to_rows(x, C), to_rows(y, C)]

    if use_mask:
        if (mask.ndim == 4 and mask.shape[0] == N and mask.shape[2:] == (H, W)
                and mask.shape[1] in (1, C)):
            m = mask
        else:
            # TODO(synk): arbitrary-broadcast masks fall back to a full (N,C,H,W) copy.
            m = jnp.broadcast_to(mask, x.shape)
        mC = m.shape[1]
        m_item = jnp.dtype(m.dtype).itemsize
        inputs.append(to_rows(m, mC))
    else:
        mC, m_item = 0, 0

    # Working-set bytes per sublane row: double-buffered x/y(/mask) DMA buffers plus
    # in-body f32 temporaries (ex list + x_max/s_sum/acc/working slabs).
    row_bytes = (2 * C * _LANES * jnp.dtype(x.dtype).itemsize
                 + 2 * C * _LANES * jnp.dtype(y.dtype).itemsize
                 + 2 * mC * _LANES * m_item
                 + (C + 5) * _LANES * 4)
    s_t, num_s = _pick_spatial_tile(s_valid, row_bytes, want_multi_tile=(N == 1))

    def _spec(c_dim):
        return pl.BlockSpec((1, c_dim, s_t, _LANES), lambda n, s: (n, 0, s, 0))

    in_specs = [_spec(C), _spec(C)]
    if use_mask:
        in_specs.append(_spec(mC))

    partials = pl.pallas_call(
        _make_dice_kernel(C, mC, s_t, s_valid, use_mask),
        out_shape=jax.ShapeDtypeStruct((N, num_s, 1, _LANES), jnp.float32),
        grid_spec=pltpu.PrefetchScalarGridSpec(
            num_scalar_prefetch=0,
            grid=(N, num_s),
            in_specs=in_specs,
            out_specs=pl.BlockSpec((1, 1, 1, _LANES), lambda n, s: (n, s, 0, 0)),
        ),
        compiler_params=pltpu.CompilerParams(
            dimension_semantics=("parallel", "parallel"),   # independent partial sums
            vmem_limit_bytes=_VMEM_LIMIT_BYTES,
        ),
    )(*inputs)

    total = jnp.sum(partials)
    if pad:
        # Padded lanes have x==0 (all channels), y==0 (and mask==0 if masked):
        #   no mask : per-element loss = 1/(C+1);   with mask : per-element loss = 1.
        per_elem = 1.0 if use_mask else 1.0 / (C + 1.0)
        total = total - jnp.float32(N * C * pad) * jnp.float32(per_elem)

    # torch .mean() divides by all N*C*H*W elements (mask or not).
    return total / jnp.float32(N * C * H * W)


def _dice_loss_ref(x, y, mask=None):
    """Pure-JAX reference matching the PyTorch forward."""
    sm = jax.nn.softmax(x.astype(jnp.float32), axis=1)
    loss = (2.0 * sm * y + 1.0) / (sm + y + 1.0)
    if mask is not None:
        loss = loss * mask
    loss = 1.0 - loss
    return jnp.mean(loss)


if __name__ == "__main__":
    key = jax.random.PRNGKey(0)
    kx, ky, km = jax.random.split(key, 3)

    # Primary example: N=2, C=4, H=W=16 (HW=256 -> zero-copy (S,128) tiling, no pad).
    N, C, H, W = 2, 4, 16, 16
    x = jax.random.normal(kx, (N, C, H, W), dtype=jnp.float32)          # logits
    y = jax.random.uniform(ky, (N, C, H, W), dtype=jnp.float32)         # soft targets
    mask = (jax.random.uniform(km, (N, 1, H, W)) > 0.3).astype(jnp.float32)

    out = jax.block_until_ready(dice_loss(x, y))
    ref = _dice_loss_ref(x, y)
    assert jnp.allclose(out, ref, atol=1e-5, rtol=1e-5), (out, ref)

    # Masked path; binary mask shipped as bf16 over the DMA (kernel casts in-register).
    out_m = jax.block_until_ready(dice_loss(x, y, mask.astype(jnp.bfloat16)))
    ref_m = _dice_loss_ref(x, y, mask)
    assert jnp.allclose(out_m, ref_m, atol=1e-5, rtol=1e-5), (out_m, ref_m)

    # Ragged spatial tiling: N=1 splits S=20 into s_t=8 tiles (last tile row-masked
    # in-kernel, no pad copy; also exercises the v7x two-TC split).
    x2 = jax.random.normal(kx, (1, 3, 40, 64), dtype=jnp.float32)
    y2 = jax.random.uniform(ky, (1, 3, 40, 64), dtype=jnp.float32)
    out2 = jax.block_until_ready(dice_loss(x2, y2))
    ref2 = _dice_loss_ref(x2, y2)
    assert jnp.allclose(out2, ref2, atol=1e-5, rtol=1e-5), (out2, ref2)

    # Lane-padded case (HW=100 not a multiple of 128 -> analytic pad correction).
    x3 = jax.random.normal(ky, (2, 4, 10, 10), dtype=jnp.float32)
    y3 = jax.random.uniform(kx, (2, 4, 10, 10), dtype=jnp.float32)
    out3 = jax.block_until_ready(dice_loss(x3, y3))
    ref3 = _dice_loss_ref(x3, y3)
    assert jnp.allclose(out3, ref3, atol=1e-5, rtol=1e-5), (out3, ref3)

    print("KERNEL_OK")
</pallas_src>

<mosaic_0001>
module attributes {stable_mosaic.version = 11 : i64} {
  func.func @kernel(%arg0: i32, %arg1: i32, %arg2: memref<1x4x2x128xf32, #tpu.memory_space<vmem>>, %arg3: memref<1x4x2x128xf32, #tpu.memory_space<vmem>>, %arg4: memref<1x1x1x128xf32, #tpu.memory_space<vmem>>) attributes {dimension_semantics = [#tpu.dimension_semantics<parallel>, #tpu.dimension_semantics<parallel>], iteration_bounds = array<i64: 2, 1>, scalar_prefetch = 0 : i64, scratch_operands = 0 : i64, tpu.core_type = #tpu.core_type<tc>, window_params = [{transform_indices = @transform_0, window_bounds = array<i64: 1, 4, 2, 128>}, {transform_indices = @transform_1, window_bounds = array<i64: 1, 4, 2, 128>}, {transform_indices = @transform_2, window_bounds = array<i64: 1, 1, 1, 128>}]} {
    %c0 = arith.constant 0 : index
    %c0_0 = arith.constant 0 : index
    %c0_1 = arith.constant 0 : index
    %c0_2 = arith.constant 0 : index
    %0 = vector.load %arg2[%c0, %c0_0, %c0_1, %c0_2] : memref<1x4x2x128xf32, #tpu.memory_space<vmem>>, vector<1x1x2x128xf32>
    %1 = vector.shape_cast %0 : vector<1x1x2x128xf32> to vector<2x128xf32>
    %c0_3 = arith.constant 0 : index
    %c1 = arith.constant 1 : index
    %c0_4 = arith.constant 0 : index
    %c0_5 = arith.constant 0 : index
    %2 = vector.load %arg2[%c0_3, %c1, %c0_4, %c0_5] : memref<1x4x2x128xf32, #tpu.memory_space<vmem>>, vector<1x1x2x128xf32>
    %3 = vector.shape_cast %2 : vector<1x1x2x128xf32> to vector<2x128xf32>
    %4 = arith.maximumf %1, %3 : vector<2x128xf32>
    %c0_6 = arith.constant 0 : index
    %c2 = arith.constant 2 : index
    %c0_7 = arith.constant 0 : index
    %c0_8 = arith.constant 0 : index
    %5 = vector.load %arg2[%c0_6, %c2, %c0_7, %c0_8] : memref<1x4x2x128xf32, #tpu.memory_space<vmem>>, vector<1x1x2x128xf32>
    %6 = vector.shape_cast %5 : vector<1x1x2x128xf32> to vector<2x128xf32>
    %7 = arith.maximumf %4, %6 : vector<2x128xf32>
    %c0_9 = arith.constant 0 : index
    %c3 = arith.constant 3 : index
    %c0_10 = arith.constant 0 : index
    %c0_11 = arith.constant 0 : index
    %8 = vector.load %arg2[%c0_9, %c3, %c0_10, %c0_11] : memref<1x4x2x128xf32, #tpu.memory_space<vmem>>, vector<1x1x2x128xf32>
    %9 = vector.shape_cast %8 : vector<1x1x2x128xf32> to vector<2x128xf32>
    %10 = arith.maximumf %7, %9 : vector<2x128xf32>
    %c0_12 = arith.constant 0 : index
    %c0_13 = arith.constant 0 : index
    %c0_14 = arith.constant 0 : index
    %c0_15 = arith.constant 0 : index
    %11 = vector.load %arg2[%c0_12, %c0_13, %c0_14, %c0_15] : memref<1x4x2x128xf32, #tpu.memory_space<vmem>>, vector<1x1x2x128xf32>
    %12 = vector.shape_cast %11 : vector<1x1x2x128xf32> to vector<2x128xf32>
    %13 = arith.subf %12, %10 : vector<2x128xf32>
    %14 = math.exp %13 : vector<2x128xf32>
    %c0_16 = arith.constant 0 : index
    %c1_17 = arith.constant 1 : index
    %c0_18 = arith.constant 0 : index
    %c0_19 = arith.constant 0 : index
    %15 = vector.load %arg2[%c0_16, %c1_17, %c0_18, %c0_19] : memref<1x4x2x128xf32, #tpu.memory_space<vmem>>, vector<1x1x2x128xf32>
    %16 = vector.shape_cast %15 : vector<1x1x2x128xf32> to vector<2x128xf32>
    %17 = arith.subf %16, %10 : vector<2x128xf32>
    %18 = math.exp %17 : vector<2x128xf32>
    %19 = arith.addf %14, %18 : vector<2x128xf32>
    %c0_20 = arith.constant 0 : index
    %c2_21 = arith.constant 2 : index
    %c0_22 = arith.constant 0 : index
    %c0_23 = arith.constant 0 : index
    %20 = vector.load %arg2[%c0_20, %c2_21, %c0_22, %c0_23] : memref<1x4x2x128xf32, #tpu.memory_space<vmem>>, vector<1x1x2x128xf32>
    %21 = vector.shape_cast %20 : vector<1x1x2x128xf32> to vector<2x128xf32>
    %22 = arith.subf %21, %10 : vector<2x128xf32>
    %23 = math.exp %22 : vector<2x128xf32>
    %24 = arith.addf %19, %23 : vector<2x128xf32>
    %c0_24 = arith.constant 0 : index
    %c3_25 = arith.constant 3 : index
    %c0_26 = arith.constant 0 : index
    %c0_27 = arith.constant 0 : index
    %25 = vector.load %arg2[%c0_24, %c3_25, %c0_26, %c0_27] : memref<1x4x2x128xf32, #tpu.memory_space<vmem>>, vector<1x1x2x128xf32>
    %26 = vector.shape_cast %25 : vector<1x1x2x128xf32> to vector<2x128xf32>
    %27 = arith.subf %26, %10 : vector<2x128xf32>
    %28 = math.exp %27 : vector<2x128xf32>
    %29 = arith.addf %24, %28 : vector<2x128xf32>
    %cst = arith.constant 0.000000e+00 : f32
    %30 = vector.broadcast %cst : f32 to vector<2x128xf32>
    %c0_28 = arith.constant 0 : index
    %c0_29 = arith.constant 0 : index
    %c0_30 = arith.constant 0 : index
    %c0_31 = arith.constant 0 : index
    %31 = vector.load %arg3[%c0_28, %c0_29, %c0_30, %c0_31] : memref<1x4x2x128xf32, #tpu.memory_space<vmem>>, vector<1x1x2x128xf32>
    %32 = vector.shape_cast %31 : vector<1x1x2x128xf32> to vector<2x128xf32>
    %cst_32 = arith.constant 2.000000e+00 : f32
    %33 = vector.broadcast %cst_32 : f32 to vector<2x128xf32>
    %34 = arith.mulf %33, %14 : vector<2x128xf32>
    %35 = arith.mulf %34, %32 : vector<2x128xf32>
    %36 = arith.addf %35, %29 : vector<2x128xf32>
    %cst_33 = arith.constant 1.000000e+00 : f32
    %37 = vector.broadcast %cst_33 : f32 to vector<2x128xf32>
    %38 = arith.addf %32, %37 : vector<2x128xf32>
    %39 = arith.mulf %29, %38 : vector<2x128xf32>
    %40 = arith.addf %14, %39 : vector<2x128xf32>
    %41 = arith.divf %36, %40 : vector<2x128xf32>
    %42 = arith.addf %30, %41 : vector<2x128xf32>
    %c0_34 = arith.constant 0 : index
    %c1_35 = arith.constant 1 : index
    %c0_36 = arith.constant 0 : index
    %c0_37 = arith.constant 0 : index
    %43 = vector.load %arg3[%c0_34, %c1_35, %c0_36, %c0_37] : memref<1x4x2x128xf32, #tpu.memory_space<vmem>>, vector<1x1x2x128xf32>
    %44 = vector.shape_cast %43 : vector<1x1x2x128xf32> to vector<2x128xf32>
    %cst_38 = arith.constant 2.000000e+00 : f32
    %45 = vector.broadcast %cst_38 : f32 to vector<2x128xf32>
    %46 = arith.mulf %45, %18 : vector<2x128xf32>
    %47 = arith.mulf %46, %44 : vector<2x128xf32>
    %48 = arith.addf %47, %29 : vector<2x128xf32>
    %cst_39 = arith.constant 1.000000e+00 : f32
    %49 = vector.broadcast %cst_39 : f32 to vector<2x128xf32>
    %50 = arith.addf %44, %49 : vector<2x128xf32>
    %51 = arith.mulf %29, %50 : vector<2x128xf32>
    %52 = arith.addf %18, %51 : vector<2x128xf32>
    %53 = arith.divf %48, %52 : vector<2x128xf32>
    %54 = arith.addf %42, %53 : vector<2x128xf32>
    %c0_40 = arith.constant 0 : index
    %c2_41 = arith.constant 2 : index
    %c0_42 = arith.constant 0 : index
    %c0_43 = arith.constant 0 : index
    %55 = vector.load %arg3[%c0_40, %c2_41, %c0_42, %c0_43] : memref<1x4x2x128xf32, #tpu.memory_space<vmem>>, vector<1x1x2x128xf32>
    %56 = vector.shape_cast %55 : vector<1x1x2x128xf32> to vector<2x128xf32>
    %cst_44 = arith.constant 2.000000e+00 : f32
    %57 = vector.broadcast %cst_44 : f32 to vector<2x128xf32>
    %58 = arith.mulf %57, %23 : vector<2x128xf32>
    %59 = arith.mulf %58, %56 : vector<2x128xf32>
    %60 = arith.addf %59, %29 : vector<2x128xf32>
    %cst_45 = arith.constant 1.000000e+00 : f32
    %61 = vector.broadcast %cst_45 : f32 to vector<2x128xf32>
    %62 = arith.addf %56, %61 : vector<2x128xf32>
    %63 = arith.mulf %29, %62 : vector<2x128xf32>
    %64 = arith.addf %23, %63 : vector<2x128xf32>
    %65 = arith.divf %60, %64 : vector<2x128xf32>
    %66 = arith.addf %54, %65 : vector<2x128xf32>
    %c0_46 = arith.constant 0 : index
    %c3_47 = arith.constant 3 : index
    %c0_48 = arith.constant 0 : index
    %c0_49 = arith.constant 0 : index
    %67 = vector.load %arg3[%c0_46, %c3_47, %c0_48, %c0_49] : memref<1x4x2x128xf32, #tpu.memory_space<vmem>>, vector<1x1x2x128xf32>
    %68 = vector.shape_cast %67 : vector<1x1x2x128xf32> to vector<2x128xf32>
    %cst_50 = arith.constant 2.000000e+00 : f32
    %69 = vector.broadcast %cst_50 : f32 to vector<2x128xf32>
    %70 = arith.mulf %69, %28 : vector<2x128xf32>
    %71 = arith.mulf %70, %68 : vector<2x128xf32>
    %72 = arith.addf %71, %29 : vector<2x128xf32>
    %cst_51 = arith.constant 1.000000e+00 : f32
    %73 = vector.broadcast %cst_51 : f32 to vector<2x128xf32>
    %74 = arith.addf %68, %73 : vector<2x128xf32>
    %75 = arith.mulf %29, %74 : vector<2x128xf32>
    %76 = arith.addf %28, %75 : vector<2x128xf32>
    %77 = arith.divf %72, %76 : vector<2x128xf32>
    %78 = arith.addf %66, %77 : vector<2x128xf32>
    %cst_52 = arith.constant dense<0.000000e+00> : vector<128xf32>
    %79 = vector.multi_reduction <add>, %78, %cst_52 [0] : vector<2x128xf32> to vector<128xf32>
    %cst_53 = arith.constant 4.000000e+00 : f32
    %cst_54 = arith.constant 2.000000e+00 : f32
    %80 = arith.mulf %cst_53, %cst_54 : f32
    %81 = vector.broadcast %80 : f32 to vector<128xf32>
    %82 = arith.subf %81, %79 : vector<128xf32>
    %83 = vector.shape_cast %82 : vector<128xf32> to vector<1x1x1x128xf32>
    %c0_55 = arith.constant 0 : index
    %c0_56 = arith.constant 0 : index
    %c0_57 = arith.constant 0 : index
    %c0_58 = arith.constant 0 : index
    %84 = vector.load %arg4[%c0_55, %c0_56, %c0_57, %c0_58] : memref<1x1x1x128xf32, #tpu.memory_space<vmem>>, vector<1x1x1x128xf32>
    tpu.vector_store %arg4[%c0_55, %c0_56, %c0_57, %c0_58], %83 {strides = array<i32>} : memref<1x1x1x128xf32, #tpu.memory_space<vmem>>, vector<1x1x1x128xf32>,
    return
  }
  func.func @transform_0(%arg0: i32, %arg1: i32) -> (i32, i32, i32, i32) {
    %c0_i32 = arith.constant 0 : i32
    %c0_i32_0 = arith.constant 0 : i32
    %c0_i32_1 = arith.constant 0 : i32
    return %arg0, %c0_i32, %arg1, %c0_i32_0 : i32, i32, i32, i32
  }
  func.func @transform_1(%arg0: i32, %arg1: i32) -> (i32, i32, i32, i32) {
    %c0_i32 = arith.constant 0 : i32
    %c0_i32_0 = arith.constant 0 : i32
    %c0_i32_1 = arith.constant 0 : i32
    return %arg0, %c0_i32, %arg1, %c0_i32_0 : i32, i32, i32, i32
  }
  func.func @transform_2(%arg0: i32, %arg1: i32) -> (i32, i32, i32, i32) {
    %c0_i32 = arith.constant 0 : i32
    %c0_i32_0 = arith.constant 0 : i32
    %c0_i32_1 = arith.constant 0 : i32
    return %arg0, %arg1, %c0_i32, %c0_i32_0 : i32, i32, i32, i32
  }
}

</mosaic_0001>

<bundles_post_ra>
// kernel: tpu_custom_call.1
= control target key start
LH: loop header
LB: loop body
LE: loop exit
PB: predicated region body
PF: predicated region fallthrough
CT: control target
= control target key end

     0   :  { %7 = vsyncpa [#allocation3], 0  ;;  %s854_s0 = inlined_call_operand.hbm [shape: f32[2,4,2,128], index: 0, kind: input, shape index: {}]   ;;  %s855_s1 = inlined_call_operand.hbm [shape: f32[2,4,2,128], index: 1, kind: input, shape index: {}]   ;;  %s856_s2 = inlined_call_operand.hbm [shape: f32[2,1,1,128], index: 2, kind: output, shape index: {}]  }
   0x1   :  { %9 = vsyncpa [#allocation3 + $0x1], 0 }
   0x2   :  { %10 = vsyncpa [#allocation6], 0 }
   0x3   :  { %12 = vsyncpa [#allocation6 + $0x1], 0 }
   0x4   :  { %13 = vsyncpa [#allocation4], 0 }
   0x5   :  { %15 = vsyncpa [#allocation4 + $0x1], 0  ;;  %s686_s9 = smov 0   ;;  %s688_s10 = smov 0  }
   0x6   :  { %s690_s11 = smov 0   ;;  %s692_s12 = smov 0  }
   0x7   :  { %s694_s13 = smov 0   ;;  %s696_s14 = smov 0  }
   0x8 LB: > { %s415_s15 = sadd.s32 4294967295, %s664_s14   ;;  %s416_s16 = sadd.s32 4294967294, %s664_s14   ;;  %s664_s14 = sphi %s696_s14, %s21_s14   ;;  %s660_s13 = sphi %s694_s13, %s868_s13   ;;  %s656_s12 = sphi %s692_s12, %s867_s12   ;;  %s652_s11 = sphi %s690_s11, %s866_s11   ;;  %s648_s10 = sphi %s688_s10, %s865_s10   ;;  %s644_s9 = sphi %s686_s9, %s864_s9  }
   0x9   : > { %s33_s17 = sadd.s32 1, %s660_s13  ;;  %s42_s18 = sadd.s32 1, %s652_s11 }
   0xa   : > { %p35_p0 = scmp.ge.s32.totalorder %s33_s17, 2  ;;  %p49_p1 = scmp.ne.s32.totalorder %s652_s11, %s648_s10 }
   0xb   : > { %p50_p2 = scmp.eq.s32.totalorder %s664_s14, 0  ;;  %p55_p3 = scmp.ne.s32.totalorder %s648_s10, %s644_s9 }
   0xc   : > { %s870_s17 = smov (%p35_p0, %s33_s17), 0  ;;  %p56_p5 = scmp.eq.s32.totalorder %s415_s15, 0 }
   0xd   : > { %p727_p4 = por %p50_p2, %p49_p1  ;;  %s37_s20 = ssub.s32 %s660_s13, %s870_s17 }
   0xe   : > { %p109_p6 = scmp.eq.s32.totalorder %s415_s15, 1  ;;  %p40_p7 = scmp.eq.s32.totalorder %s37_s20, 0 }
   0xf   : > { %p733_p8 = por %p56_p5, %p55_p3  ;;  %p115_p10 = scmp.eq.s32.totalorder %s416_s16, 1 }
  0x10   : > { %p737_p9 = por %p109_p6, %p49_p1  ;;  %p456_p13 = scmp.lt.s32.totalorder %s664_s14, 2 }
  0x11   : > { %s742_s23 = scalar_select %p40_p7, %s652_s11, %s42_s18  }
  0x12   : > { %p744_p11 = por %p115_p10, %p55_p3  ;;  %s751_s25 = sand.u32 1, %s652_s11  }
  0x13   : > { %s419_s26 = sshll.u32 %s751_s25, 3  ;;  %s437_s27 = sshll.u32 %s660_s13, 7 }
  0x14   : > { %s146_s30 = scalar_lea.hbm %s854_s0, %s437_s27  ;;  %s139_s3 = scalar_lea.vmem [#allocation2], %s419_s26 }
  0x15   : > { %s147_s4 = sshll.u32 %s139_s3, 4  ;;  %p764_p0 = pnand %p456_p13, %p727_p4  ;;  %s148_s4 = int_to_ptr.vmem [resolvable:$true] %s147_s4 }
  0x16   : > { %p425_p1 = scmp.ge.s32.totalorder %s664_s14, 1  ;;  %s136_s6 = scalar_lea.sflag [#allocation3], %s751_s25 }
  0x17   : > { %p526_p2 = pneg %p764_p0  ;;  %s537_s7 = scalar_lea.vmem %s148_s4, 128 }
  0x18   : > { %p538_p3 = scmp.ne.s32.totalorder %s148_s4, %s537_s7  ;;  %s666_s8 = smov [#allocation2]  }
  0x19   : > { %s542_s15 = sshll.u32 %s666_s8, 4  ;;  %s543_s15 = int_to_ptr.vmem [resolvable:$false] %s542_s15 }
  0x1a   : > { %p540_p5 = pnand %p538_p3, %p526_p2  ;;  %s544_s16 = scalar_lea.vmem %s543_s15, 256 }
  0x1b   : > { %p545_p4 = scmp.lt.s32.totalorder %s148_s4, %s543_s15  ;;  %p546_p7 = scmp.lt.s32.totalorder %s544_s16, %s537_s7 }
  0x1c   : > { %p541_p6 = pneg %p540_p5 }
  0x1d   : > { %p547_p10 = por %p546_p7, %p545_p4 }
  0x1f   : > { %p548_p13 = pnand %p547_p10, %p541_p6 }
  0x21   : > { %551 = shalt.err (!%p548_p13)
}
  0x22   : > { %s667_s18 = smov 32   ;;  %s668_s19 = smov 2  }
  0x23   : > { %448 = dma.hbm_to_vmem [thread:$0]  (!%p764_p0), %s146_s30, 128, %s148_s4, %s136_s6, %s667_s18, %s667_s18, %s668_s19  }
  0x24   : > { %p177_p3 = scmp.lt.s32.totalorder %s664_s14, 3  ;;  %s168_s29 = scalar_lea.hbm %s855_s1, %s437_s27 }
  0x25   : > { %s161_s7 = scalar_lea.vmem [#allocation5], %s419_s26  ;;  %s158_s15 = scalar_lea.sflag [#allocation6], %s751_s25 }
  0x26   : > { %p785_p5 = pnand %p425_p1, %p177_p3  ;;  %s169_s8 = sshll.u32 %s161_s7, 4  ;;  %s170_s8 = int_to_ptr.vmem [resolvable:$true] %s169_s8 }
  0x27   : > { %s565_s16 = scalar_lea.vmem %s170_s8, 128  ;;  %s669_s30 = smov [#allocation5]  }
  0x28   : > { %p566_p6 = scmp.ne.s32.totalorder %s170_s8, %s565_s16  ;;  %s570_s4 = sshll.u32 %s669_s30, 4  ;;  %s571_s4 = int_to_ptr.vmem [resolvable:$false] %s570_s4 }
  0x29   : > { %s572_s27 = scalar_lea.vmem %s571_s4, 256  ;;  %p573_p10 = scmp.lt.s32.totalorder %s170_s8, %s571_s4 }
  0x2a   : > { %p568_p4 = pnand %p566_p6, %p526_p2  ;;  %p574_p1 = scmp.lt.s32.totalorder %s572_s27, %s565_s16 }
  0x2c   : > { %p569_p7 = pneg %p568_p4  ;;  %p575_p13 = por %p574_p1, %p573_p10 }
  0x2e   : > { %p576_p3 = pnand %p575_p13, %p569_p7 }
  0x30   : > { %579 = shalt.err (!%p576_p3)
}
  0x31   : > { %451 = dma.hbm_to_vmem [thread:$0]  (!%p764_p0), %s168_s29, 128, %s170_s8, %s158_s15, %s667_s18, %s667_s18, %s668_s19  }
  0x32   : > { %181 = sbr.rel (%p785_p5) target bundleno = 145 (0x91), region = 28  ;;  %s800_s25 = sand.u32 (!%p785_p5), 1, %s648_s10  }
  0x33   : > { %s426_s26 = sshll.u32 (!%p785_p5), %s800_s25, 3  ;;  %s184_s6 = scalar_lea.sflag (!%p785_p5), [#allocation3], %s800_s25 }
  0x34   : > { %s187_s20 = scalar_lea.vmem (!%p785_p5), [#allocation2], %s426_s26 }
  0x37   : > { %631 = dma.done.wait (%p733_p8), %s184_s6, 128  }
  0x38   : > { %633 = vsyncadd (%p733_p8), %s184_s6, 4294967168  ;;  %s193_s5 = scalar_lea.sflag [#allocation6], %s800_s25  ;;  %s196_s18 = scalar_lea.vmem [#allocation5], %s426_s26 }
  0x39   : > { %635 = dma.done.wait (%p733_p8), %s193_s5, 128  }
  0x3a   : > { %637 = vsyncadd (%p733_p8), %s193_s5, 4294967168  ;;  %v221_v0 = vld [vmem:[%s187_s20] sm:$0x3]  ;;  %v428_v1 = vld [vmem:[%s187_s20 + $0x2] sm:$0x3]  ;;  %vm289_vm0 = vcmask 1041408  }
  0x3b   : > { %v429_v2 = vld [vmem:[%s187_s20 + $0x4] sm:$0x3]  ;;  %v224_v3 = vmax.f32 %v221_v0, %v428_v1  ;;  %v430_v4 = vld [vmem:[%s187_s20 + $0x6] sm:$0x3]  ;;  %v246_v17 = vld [vmem:[%s196_s18] sm:$0x3] }
  0x3c   : > { %v431_v18 = vld [vmem:[%s196_s18 + $0x2] sm:$0x3]  ;;  %v432_v21 = vld [vmem:[%s196_s18 + $0x4] sm:$0x3]  ;;  %v433_v22 = vld [vmem:[%s196_s18 + $0x6] sm:$0x3] }
  0x3d   : > { %v227_v5 = vmax.f32 %v224_v3, %v429_v2  ;;  %v250_v25 = vadd.f32 1.0, %v246_v17  ;;  %v261_v26 = vadd.f32 1.0, %v431_v18  ;;  %v272_v27 = vadd.f32 1.0, %v432_v21  ;;  %s220_s21 = scalar_lea.vmem [#allocation7], %s800_s25  ;;  %s434_s28 = sshll.u32 %s656_s12, 4 }
  0x3e   : > { %v283_v28 = vadd.f32 1.0, %v433_v22  ;;  %s313_s19 = sshll.u32 %s220_s21, 4  ;;  %s311_s7 = scalar_lea.hbm %s856_s2, %s434_s28  ;;  %s314_s19 = int_to_ptr.vmem [resolvable:$true] %s313_s19 }
  0x3f   : > { %v230_v6 = vmax.f32 %v227_v5, %v430_v4  ;;  %s300_s8 = scalar_lea.sflag [#allocation4], %s800_s25  ;;  %s580_s15 = scalar_lea.vmem %s314_s19, 16 }
  0x40   : > { %p581_p8 = scmp.ne.s32.totalorder %s314_s19, %s580_s15  ;;  %s670_s16 = smov [#allocation7]  }
  0x41   : > { %v231_v7 = vsub.f32 %v221_v0, %v230_v6  ;;  %v234_v8 = vsub.f32 %v428_v1, %v230_v6  ;;  %v238_v9 = vsub.f32 %v429_v2, %v230_v6  ;;  %v242_v10 = vsub.f32 %v430_v4, %v230_v6  ;;  %s584_s30 = sshll.u32 %s670_s16, 4  ;;  %s585_s30 = int_to_ptr.vmem [resolvable:$false] %s584_s30 }
  0x42   : > { %p582_p0 = pnand %p581_p8, %p737_p9  ;;  %s586_s4 = scalar_lea.vmem %s585_s30, 32 }
  0x43   : > { %v232_v11 = vmul.f32 1.442695, %v231_v7  ;;  %v235_v12 = vmul.f32 1.442695, %v234_v8  ;;  %v239_v13 = vmul.f32 1.442695, %v238_v9  ;;  %p587_p5 = scmp.lt.s32.totalorder %s314_s19, %s585_s30  ;;  %p588_p6 = scmp.lt.s32.totalorder %s586_s4, %s580_s15 }
  0x44   : > { %v243_v14 = vmul.f32 1.442695, %v242_v10  ;;  %p583_p2 = pneg %p582_p0 }
  0x45   : > { %508 = vpow2.f32 %v232_v11  ;;  %p589_p4 = por %p588_p6, %p587_p5 }
  0x46   : > { %510 = vpow2.f32 %v235_v12 }
  0x47   : > { %512 = vpow2.f32 %v239_v13  ;;  %p590_p7 = pnand %p589_p4, %p583_p2 }
  0x48   : > { %514 = vpow2.f32 %v243_v14 }
  0x52   : > { %v509_v15 = vpop.eup %508 }
  0x53   : > { %v511_v16 = vpop.eup %510  ;;  %v247_v38 = vmul.f32 2.0, %v509_v15 }
  0x54   : > { %v513_v19 = vpop.eup %512  ;;  %v237_v20 = vadd.f32 %v511_v16, %v509_v15  ;;  %v258_v39 = vmul.f32 2.0, %v511_v16 }
  0x55   : > { %v515_v23 = vpop.eup %514  ;;  %v269_v40 = vmul.f32 2.0, %v513_v19  ;;  %v248_v42 = vmul.f32 %v247_v38, %v246_v17 }
  0x56   : > { %v241_v24 = vadd.f32 %v513_v19, %v237_v20  ;;  %v280_v41 = vmul.f32 2.0, %v515_v23  ;;  %v259_v43 = vmul.f32 %v431_v18, %v258_v39 }
  0x57   : > { %v270_v44 = vmul.f32 %v432_v21, %v269_v40 }
  0x58   : > { %v245_v29 = vadd.f32 %v515_v23, %v241_v24  ;;  %v281_v45 = vmul.f32 %v433_v22, %v280_v41 }
  0x5a   : > { %v251_v30 = vmul.f32 %v250_v25, %v245_v29  ;;  %v262_v31 = vmul.f32 %v261_v26, %v245_v29  ;;  %v273_v32 = vmul.f32 %v272_v27, %v245_v29  ;;  %v284_v33 = vmul.f32 %v283_v28, %v245_v29 }
  0x5b   : > { %v249_v46 = vadd.f32 %v248_v42, %v245_v29  ;;  %v260_v47 = vadd.f32 %v259_v43, %v245_v29  ;;  %v271_v48 = vadd.f32 %v270_v44, %v245_v29  ;;  %v282_v50 = vadd.f32 %v281_v45, %v245_v29 }
  0x5c   : > { %v252_v34 = vadd.f32 %v509_v15, %v251_v30  ;;  %v263_v35 = vadd.f32 %v511_v16, %v262_v31  ;;  %v274_v36 = vadd.f32 %v513_v19, %v273_v32  ;;  %v285_v37 = vadd.f32 %v515_v23, %v284_v33 }
  0x5e   : > { %516 = vrcp.f32 %v252_v34 }
  0x5f   : > { %518 = vrcp.f32 %v263_v35 }
  0x60   : > { %520 = vrcp.f32 %v274_v36 }
  0x61   : > { %522 = vrcp.f32 %v285_v37 }
  0x6b   : > { %v517_v49 = vpop.eup %516 }
  0x6c   : > { %v519_v51 = vpop.eup %518  ;;  %v254_v52 = vmul.f32 %v517_v49, %v249_v46 }
  0x6d   : > { %v521_v53 = vpop.eup %520  ;;  %v265_v54 = vmul.f32 %v519_v51, %v260_v47 }
  0x6e   : > { %v523_v55 = vpop.eup %522  ;;  %v276_v56 = vmul.f32 %v521_v53, %v271_v48 }
  0x6f   : > { %v266_v57 = vadd.f32 %v265_v54, %v254_v52  ;;  %v287_v58 = vmul.f32 %v523_v55, %v282_v50 }
  0x71   : > { %v277_v59 = vadd.f32 %v276_v56, %v266_v57 }
  0x73   : > { %v288_v60 = vadd.f32 %v287_v58, %v277_v59 }
  0x75   : > { %v290_v61 = vsel %vm289_vm0, %v288_v60, 0.0 }
  0x76   : > { %v291_v62 = vrot.slane %v290_v61, 4 }
  0x78   : > { %v292_v63 = vadd.f32 %v291_v62, %v290_v61 }
  0x7a   : > { %v293_v0 = vrot.slane %v292_v63, 2 }
  0x7c   : > { %v294_v1 = vadd.f32 %v293_v0, %v292_v63 }
  0x7e   : > { %v295_v2 = vrot.slane %v294_v1, 1 }
  0x80   : > { %v296_v3 = vadd.f32 %v295_v2, %v294_v1 }
  0x82   : > { %v297_v4 = vsub.f32 8.0, %v296_v3 }
  0x84   : > { %298 = vst [vmem:[%s220_s21] sm:$0x1] %v297_v4 }
  0x85   : > { %593 = shalt.err (!%p590_p7)
}
  0x86   : > { %s594_s12 = scalar_lea.hbm %s311_s7, 16  ;;  %s598_s26 = scalar_lea.hbm %s856_s2, 32 }
  0x87   : > { %p595_p10 = scmp.ne.s32.totalorder %s311_s7, %s594_s12  ;;  %p599_p3 = scmp.lt.s32.totalorder %s311_s7, %s856_s2 }
  0x88   : > { %p600_p8 = scmp.lt.s32.totalorder %s598_s26, %s594_s12 }
  0x89   : > { %p596_p1 = pnand %p595_p10, %p737_p9 }
  0x8a   : > { %p601_p0 = por %p600_p8, %p599_p3 }
  0x8b   : > { %p597_p13 = pneg %p596_p1 }
  0x8d   : > { %p602_p12 = pnand %p601_p0, %p597_p13 }
  0x8f   : > { %605 = shalt.err (!%p602_p12)
}
  0x90   : > { %443 = dma.vmem_to_hbm [thread:$0]  (%p737_p9), %s314_s19, 16, %s311_s7, %s300_s8  }
  0x91 PF: > { %s325_s5 = sand.u32 1, %s644_s9   ;;  %p863_p2 = scmp.ge.s32.totalorder %s664_s14, 2 }
  0x92   : > { %s326_s18 = scalar_lea.sflag [#allocation4], %s325_s5 }
  0x93   : > { %p453_p5 = pnand %p863_p2, %p744_p11 }
  0x95   : > { %p454_p6 = pneg %p453_p5 }
  0x97   : > { %639 = dma.done.wait (%p454_p6), %s326_s18, 16  }
  0x98   : > { %641 = vsyncadd (%p454_p6), %s326_s18, 4294967280  ;;  %s21_s14 = sadd.s32 1, %s664_s14   ;;  %s864_s9 = smov %s648_s10 }
  0x99   : > { %p18_p4 = scmp.ge.s32.totalorder %s21_s14, 4   ;;  %s865_s10 = smov %s652_s11 }
  0x9a   : > { %s866_s11 = smov %s742_s23  ;;  %s867_s12 = smov %s660_s13 }
  0x9b   : > { %s868_s13 = smov %s870_s17  ;;  %20 = sbr.rel (!%p18_p4) target bundleno = 8 (0x8), region = 92 }
  0xa0   :  { %330 = vsyncpa [#allocation3], 1 }
  0xa1   :  { %332 = vsyncpa [#allocation3 + $0x1], 1 }
  0xa2   :  { %333 = vsyncpa [#allocation6], 1 }
  0xa3   :  { %335 = vsyncpa [#allocation6 + $0x1], 1 }
  0xa4   :  { %336 = vsyncpa [#allocation4], 1 }
  0xa5   :  { %338 = vsyncpa [#allocation4 + $0x1], 1 }

</bundles_post_ra>
